<compile_context>
chip_gen: v7x
topology: tpu7x:2x2x1
jax: 0.10.0
libtpu: 0.0.40
codegen_flags: <defaults>
</compile_context>

<pallas_src>
import functools

import jax
import jax.numpy as jnp
from jax import lax
from jax.experimental import pallas as pl
from jax.experimental.pallas import tpu as pltpu


def _round_up(x, m):
    return ((x + m - 1) // m) * m


# ---------------------------------------------------------------------------
# K1: fused fc1 + ReLU + LSTM-1 input projection (batched MXU matmuls)
# ---------------------------------------------------------------------------
def _proj1_kernel(x_ref, w1_ref, b1_ref, wg_ref, bg_ref, o_ref):
    x = x_ref[...]                                     # bf16 (t1, Bp, Dp)
    x2 = x.reshape(-1, x.shape[-1])
    h = jnp.dot(x2, w1_ref[...], preferred_element_type=jnp.float32) + b1_ref[...]
    h = jnp.maximum(h, 0.0)                            # ReLU (f32)
    g = jnp.dot(h.astype(jnp.bfloat16), wg_ref[...],
                preferred_element_type=jnp.float32) + bg_ref[...]
    o_ref[...] = g.reshape(o_ref.shape).astype(o_ref.dtype)


def _proj1(x_p, w1, b1, wg, bg, t_blk):
    T, Bp, Dp = x_p.shape
    G8 = wg.shape[1]
    n_tb = T // t_blk
    return pl.pallas_call(
        _proj1_kernel,
        out_shape=jax.ShapeDtypeStruct((T, Bp, G8), jnp.bfloat16),
        grid_spec=pltpu.PrefetchScalarGridSpec(
            num_scalar_prefetch=0,
            grid=(n_tb,),
            in_specs=[
                pl.BlockSpec((t_blk, Bp, Dp), lambda g: (g, 0, 0)),
                pl.BlockSpec(w1.shape, lambda g: (0, 0)),
                pl.BlockSpec(b1.shape, lambda g: (0, 0)),
                pl.BlockSpec(wg.shape, lambda g: (0, 0)),
                pl.BlockSpec(bg.shape, lambda g: (0, 0)),
            ],
            out_specs=pl.BlockSpec((t_blk, Bp, G8), lambda g: (g, 0, 0)),
        ),
        compiler_params=pltpu.CompilerParams(
            dimension_semantics=("parallel",)),
    )(x_p, w1, b1, wg, bg)


# ---------------------------------------------------------------------------
# K3: layer-2 input projection  gates2 = fwd1 @ W_top + bwd1 @ W_bot + b
# ---------------------------------------------------------------------------
def _proj2_kernel(af_ref, ab_ref, wt_ref, wb_ref, b_ref, o_ref):
    af = af_ref[...]                                   # bf16
    ab = ab_ref[...]
    af2 = af.reshape(-1, af.shape[-1])
    ab2 = ab.reshape(-1, ab.shape[-1])
    g = (jnp.dot(af2, wt_ref[...], preferred_element_type=jnp.float32)
         + jnp.dot(ab2, wb_ref[...], preferred_element_type=jnp.float32)
         + b_ref[...])
    o_ref[...] = g.reshape(o_ref.shape).astype(o_ref.dtype)


def _proj2(af, ab, wt, wb, b, t_blk):
    T, Bp, Hp = af.shape
    G8 = wt.shape[1]
    n_tb = T // t_blk
    return pl.pallas_call(
        _proj2_kernel,
        out_shape=jax.ShapeDtypeStruct((T, Bp, G8), jnp.bfloat16),
        grid_spec=pltpu.PrefetchScalarGridSpec(
            num_scalar_prefetch=0,
            grid=(n_tb,),
            in_specs=[
                pl.BlockSpec((t_blk, Bp, Hp), lambda g: (g, 0, 0)),
                pl.BlockSpec((t_blk, Bp, Hp), lambda g: (g, 0, 0)),
                pl.BlockSpec(wt.shape, lambda g: (0, 0)),
                pl.BlockSpec(wb.shape, lambda g: (0, 0)),
                pl.BlockSpec(b.shape, lambda g: (0, 0)),
            ],
            out_specs=pl.BlockSpec((t_blk, Bp, G8), lambda g: (g, 0, 0)),
        ),
        compiler_params=pltpu.CompilerParams(
            dimension_semantics=("parallel",)),
    )(af, ab, wt, wb, b)


# ---------------------------------------------------------------------------
# K2: fused bidirectional LSTM recurrence (layer 1)
# Gate layout is (i, f, o, g), each padded to h_pad lanes: one wide sigmoid on
# [:, :3*h_pad] plus one tanh on [:, 3*h_pad:] per direction per step.
# h/c are carried through the fori_loop (vregs); VMEM scratch is touched once
# per grid block, purely to persist state across time blocks.
# ---------------------------------------------------------------------------
def _bilstm_kernel(gf_ref, gb_ref, whf_ref, whb_ref, of_ref, ob_ref,
                   hf, cf, hb, cb, *, h_pad, t_blk, t_valid):
    g_idx = pl.program_id(0)
    n_tb = pl.num_programs(0)

    @pl.when(g_idx == 0)
    def _():
        hf[...] = jnp.zeros_like(hf)
        cf[...] = jnp.zeros_like(cf)
        hb[...] = jnp.zeros_like(hb)
        cb[...] = jnp.zeros_like(cb)

    whf = whf_ref[...]     # bf16, resident
    whb = whb_ref[...]
    h3 = 3 * h_pad

    def cell(g_pre, h, c, whh):
        rec = jnp.dot(h.astype(jnp.bfloat16), whh,
                      preferred_element_type=jnp.float32)
        gates = g_pre.astype(jnp.float32) + rec
        ifo = jax.nn.sigmoid(gates[:, :h3])
        g = jnp.tanh(gates[:, h3:])
        i = ifo[:, :h_pad]
        f = ifo[:, h_pad:2 * h_pad]
        o = ifo[:, 2 * h_pad:h3]
        c_new = f * c + i * g
        h_new = o * jnp.tanh(c_new)
        return h_new, c_new

    t0_fwd = g_idx * t_blk
    t0_bwd = (n_tb - 1 - g_idx) * t_blk

    def step(s, carry):
        hf_v, cf_v, hb_v, cb_v = carry
        # forward direction, global time t0_fwd + s
        hf_n, cf_n = cell(gf_ref[s], hf_v, cf_v, whf)
        if t_valid is not None:
            keep = ((t0_fwd + s) < t_valid).astype(jnp.float32)
            hf_n = hf_v + keep * (hf_n - hf_v)
            cf_n = cf_v + keep * (cf_n - cf_v)
        of_ref[s] = hf_n.astype(of_ref.dtype)
        # backward direction, descending time within its reversed block
        r = t_blk - 1 - s
        hb_n, cb_n = cell(gb_ref[r], hb_v, cb_v, whb)
        if t_valid is not None:
            keep_b = ((t0_bwd + r) < t_valid).astype(jnp.float32)
            hb_n = hb_v + keep_b * (hb_n - hb_v)
            cb_n = cb_v + keep_b * (cb_n - cb_v)
        ob_ref[r] = hb_n.astype(ob_ref.dtype)
        return (hf_n, cf_n, hb_n, cb_n)

    carry = lax.fori_loop(0, t_blk, step,
                          (hf[...], cf[...], hb[...], cb[...]),
                          unroll=min(2, t_blk))
    hf[...], cf[...], hb[...], cb[...] = carry


def _bilstm_layer(gates, whh_f, whh_b, h_pad, t_blk, t_valid):
    T, Bp, _ = gates.shape
    n_tb = T // t_blk
    g4 = 4 * h_pad
    kernel = functools.partial(_bilstm_kernel, h_pad=h_pad, t_blk=t_blk,
                               t_valid=t_valid)
    return pl.pallas_call(
        kernel,
        out_shape=(jax.ShapeDtypeStruct((T, Bp, h_pad), jnp.bfloat16),
                   jax.ShapeDtypeStruct((T, Bp, h_pad), jnp.bfloat16)),
        grid_spec=pltpu.PrefetchScalarGridSpec(
            num_scalar_prefetch=0,
            grid=(n_tb,),
            in_specs=[
                # forward gates: columns [0:4Hp], blocks in natural order
                pl.BlockSpec((t_blk, Bp, g4), lambda g: (g, 0, 0)),
                # backward gates: columns [4Hp:8Hp], blocks in reverse order
                pl.BlockSpec((t_blk, Bp, g4), lambda g: (n_tb - 1 - g, 0, 1)),
                pl.BlockSpec(whh_f.shape, lambda g: (0, 0)),
                pl.BlockSpec(whh_b.shape, lambda g: (0, 0)),
            ],
            out_specs=[
                pl.BlockSpec((t_blk, Bp, h_pad), lambda g: (g, 0, 0)),
                pl.BlockSpec((t_blk, Bp, h_pad), lambda g: (n_tb - 1 - g, 0, 0)),
            ],
            scratch_shapes=[pltpu.VMEM((Bp, h_pad), jnp.float32)] * 4,
        ),
        compiler_params=pltpu.CompilerParams(
            dimension_semantics=("arbitrary",)),
    )(gates, gates, whh_f, whh_b)


# ---------------------------------------------------------------------------
# K4: layer-2 forward recurrence to final h + single backward step + fused fc2
# ---------------------------------------------------------------------------
def _lstm2_final_kernel(gf_ref, gb_ref, whh_ref, wof_ref, wob_ref, bo_ref,
                        o_ref, hf, cf, *, h_pad, t_blk, t_valid):
    g_idx = pl.program_id(0)

    @pl.when(g_idx == 0)
    def _():
        hf[...] = jnp.zeros_like(hf)
        cf[...] = jnp.zeros_like(cf)

    whh = whh_ref[...]
    h3 = 3 * h_pad
    t0 = g_idx * t_blk

    def step(s, carry):
        h_v, c_v = carry
        rec = jnp.dot(h_v.astype(jnp.bfloat16), whh,
                      preferred_element_type=jnp.float32)
        gates = gf_ref[s].astype(jnp.float32) + rec
        ifo = jax.nn.sigmoid(gates[:, :h3])
        g = jnp.tanh(gates[:, h3:])
        i = ifo[:, :h_pad]
        f = ifo[:, h_pad:2 * h_pad]
        o = ifo[:, 2 * h_pad:h3]
        c_n = f * c_v + i * g
        h_n = o * jnp.tanh(c_n)
        if t_valid is not None:
            keep = ((t0 + s) < t_valid).astype(jnp.float32)
            h_n = h_v + keep * (h_n - h_v)
            c_n = c_v + keep * (c_n - c_v)
        return (h_n, c_n)

    h_v, c_v = lax.fori_loop(0, t_blk, step, (hf[...], cf[...]),
                             unroll=min(2, t_blk))
    hf[...] = h_v
    cf[...] = c_v

    @pl.when(g_idx == pl.num_programs(0) - 1)
    def _():
        # backward direction: only one step (at the last *real* t), h0=c0=0,
        # so the recurrent matmul and the forget-gate term vanish.
        gb = gb_ref[0].astype(jnp.float32)
        ifo = jax.nn.sigmoid(gb[:, :h3])
        i = ifo[:, :h_pad]
        o = ifo[:, 2 * h_pad:h3]
        g = jnp.tanh(gb[:, h3:])
        h_b = o * jnp.tanh(i * g)
        out = (jnp.dot(h_v, wof_ref[...], preferred_element_type=jnp.float32)
               + jnp.dot(h_b, wob_ref[...], preferred_element_type=jnp.float32)
               + bo_ref[...])
        o_ref[...] = out.astype(o_ref.dtype)


def _lstm2_final(gates, whh_f, wout_f, wout_b, bout, h_pad, t_blk, t_valid,
                 t_real):
    T, Bp, _ = gates.shape
    n_tb = T // t_blk
    g4 = 4 * h_pad
    out_pad = wout_f.shape[1]
    t_last = t_real - 1
    kernel = functools.partial(_lstm2_final_kernel, h_pad=h_pad, t_blk=t_blk,
                               t_valid=t_valid)
    return pl.pallas_call(
        kernel,
        out_shape=jax.ShapeDtypeStruct((Bp, out_pad), jnp.float32),
        grid_spec=pltpu.PrefetchScalarGridSpec(
            num_scalar_prefetch=0,
            grid=(n_tb,),
            in_specs=[
                # forward gates (columns [0:4Hp]), streamed over time blocks
                pl.BlockSpec((t_blk, Bp, g4), lambda g: (g, 0, 0)),
                # backward gates only at the last real t (cols [4Hp:8Hp]), resident
                pl.BlockSpec((1, Bp, g4), lambda g: (t_last, 0, 1)),
                pl.BlockSpec(whh_f.shape, lambda g: (0, 0)),
                pl.BlockSpec(wout_f.shape, lambda g: (0, 0)),
                pl.BlockSpec(wout_b.shape, lambda g: (0, 0)),
                pl.BlockSpec(bout.shape, lambda g: (0, 0)),
            ],
            out_specs=pl.BlockSpec((Bp, out_pad), lambda g: (0, 0)),
            scratch_shapes=[pltpu.VMEM((Bp, h_pad), jnp.float32)] * 2,
        ),
        compiler_params=pltpu.CompilerParams(
            dimension_semantics=("arbitrary",)),
    )(gates, gates, whh_f, wout_f, wout_b, bout)


# ---------------------------------------------------------------------------
# Parameter padding: gates re-laid out as (i, f, o, g), each gate starting at
# a 128-lane boundary.  All padding is with zeros, which provably keeps the
# padded hidden columns at exactly 0 through the recurrence.  MXU-side weights
# are pre-cast to bf16; biases / fc2 stay f32.
# ---------------------------------------------------------------------------
_GATE_ORDER = (0, 1, 3, 2)   # source gates are (i, f, g, o); dest is (i, f, o, g)


def _pad_gate_mat(w, h, h_pad, din_pad, dtype=jnp.float32):
    d_in = w.shape[0]
    out = jnp.zeros((din_pad, 4 * h_pad), jnp.float32)
    for dst, src in enumerate(_GATE_ORDER):
        out = out.at[:d_in, dst * h_pad:dst * h_pad + h].set(
            w[:, src * h:(src + 1) * h])
    return out.astype(dtype)


def _pad_gate_vec(b, h, h_pad):
    out = jnp.zeros((4 * h_pad,), jnp.float32)
    for dst, src in enumerate(_GATE_ORDER):
        out = out.at[dst * h_pad:dst * h_pad + h].set(b[src * h:(src + 1) * h])
    return out


def prepare_params(params, input_dim, hidden_dim, lstm_hidden, output_dim):
    H = lstm_hidden
    Hp = _round_up(H, 128)
    Dp = _round_up(input_dim, 128)
    HIDp = _round_up(hidden_dim, 128)
    OUTp = _round_up(output_dim, 128)
    bf16 = jnp.bfloat16
    l1, l2 = params["lstm1"], params["lstm2"]

    fc1_w = (jnp.zeros((Dp, HIDp), jnp.float32)
             .at[:input_dim, :hidden_dim].set(params["fc1_w"])).astype(bf16)
    fc1_b = jnp.zeros((1, HIDp), jnp.float32).at[0, :hidden_dim].set(params["fc1_b"])

    wih1 = jnp.concatenate([_pad_gate_mat(l1["w_ih_f"], H, Hp, HIDp, bf16),
                            _pad_gate_mat(l1["w_ih_b"], H, Hp, HIDp, bf16)], axis=1)
    bih1 = jnp.concatenate([_pad_gate_vec(l1["b_f"], H, Hp),
                            _pad_gate_vec(l1["b_b"], H, Hp)])[None, :]
    whh1_f = _pad_gate_mat(l1["w_hh_f"], H, Hp, Hp, bf16)
    whh1_b = _pad_gate_mat(l1["w_hh_b"], H, Hp, Hp, bf16)

    # layer-2 input weights act on concat([fwd1, bwd1]); split rows so the
    # concat never has to be materialized.
    w2f, w2b = l2["w_ih_f"], l2["w_ih_b"]
    wih2_top = jnp.concatenate([_pad_gate_mat(w2f[:H], H, Hp, Hp, bf16),
                                _pad_gate_mat(w2b[:H], H, Hp, Hp, bf16)], axis=1)
    wih2_bot = jnp.concatenate([_pad_gate_mat(w2f[H:], H, Hp, Hp, bf16),
                                _pad_gate_mat(w2b[H:], H, Hp, Hp, bf16)], axis=1)
    bih2 = jnp.concatenate([_pad_gate_vec(l2["b_f"], H, Hp),
                            _pad_gate_vec(l2["b_b"], H, Hp)])[None, :]
    whh2_f = _pad_gate_mat(l2["w_hh_f"], H, Hp, Hp, bf16)

    fc2 = params["fc2_w"]
    wout_f = jnp.zeros((Hp, OUTp), jnp.float32).at[:H, :output_dim].set(fc2[:H])
    wout_b = jnp.zeros((Hp, OUTp), jnp.float32).at[:H, :output_dim].set(fc2[H:])
    bout = jnp.zeros((1, OUTp), jnp.float32).at[0, :output_dim].set(params["fc2_b"])

    return {
        "fc1_w": fc1_w, "fc1_b": fc1_b,
        "wih1": wih1, "bih1": bih1, "whh1_f": whh1_f, "whh1_b": whh1_b,
        "wih2_top": wih2_top, "wih2_bot": wih2_bot, "bih2": bih2,
        "whh2_f": whh2_f,
        "wout_f": wout_f, "wout_b": wout_b, "bout": bout,
        "h_pad": Hp, "d_in": input_dim, "d_pad": Dp, "out_dim": output_dim,
    }


# ---------------------------------------------------------------------------
# Model forward (mirrors NNBiLSTM.forward; dropout = identity in eval mode)
# ---------------------------------------------------------------------------
def nn_bilstm_forward(x, pp, *, t2_blk=8, t1_blk=None):
    if x.ndim == 2:                       # torch unsqueezes after fc1; fc1 is
        x = x[:, None, :]                 # row-wise so this is equivalent.
    B, T, d_in = x.shape
    assert d_in == pp["d_in"]

    Bp = _round_up(B, 8)
    Hp = pp["h_pad"]
    Dp = pp["d_pad"]

    # Pad T up to a multiple of the recurrence time block; padded steps are
    # masked inside K2/K4 (h/c frozen), so the block never degrades to 1.
    t2_blk = max(1, int(t2_blk))
    T_pad = _round_up(T, t2_blk)
    t_valid = None if T_pad == T else T

    # K1/K3 time block: largest divisor of T_pad whose bf16 gate block stays
    # under a ~2 MiB VMEM budget (fills the MXU M dim, amortizes grid-step
    # overhead, and keeps double-buffering comfortable even on v7x's 64 MiB).
    if t1_blk is None:
        budget = 2 * 1024 * 1024
        t1_blk = 1
        for d in range(T_pad, 0, -1):
            if T_pad % d == 0 and d * Bp * 8 * Hp * 2 <= budget:
                t1_blk = d
                break

    # time-major + pad; bf16 so K1 reads MXU-native operands (half the bytes).
    x_tm = jnp.transpose(x, (1, 0, 2)).astype(jnp.bfloat16)
    x_p = jnp.zeros((T_pad, Bp, Dp), jnp.bfloat16).at[:T, :B, :d_in].set(x_tm)

    # K1: fused fc1 + ReLU + layer-1 input projection -> (T_pad, Bp, 8Hp) bf16
    gates1 = _proj1(x_p, pp["fc1_w"], pp["fc1_b"], pp["wih1"], pp["bih1"], t1_blk)
    # K2: fused bidirectional recurrence (only h @ W_hh in the serial loop)
    fwd1, bwd1 = _bilstm_layer(gates1, pp["whh1_f"], pp["whh1_b"], Hp, t2_blk,
                               t_valid)
    # K3: layer-2 input projection (no concat materialized)
    gates2 = _proj2(fwd1, bwd1, pp["wih2_top"], pp["wih2_bot"], pp["bih2"], t1_blk)
    # K4: layer-2 fwd-final + single bwd step + fused fc2
    out_p = _lstm2_final(gates2, pp["whh2_f"], pp["wout_f"], pp["wout_b"],
                         pp["bout"], Hp, t2_blk, t_valid, T)
    return out_p[:B, :pp["out_dim"]]


# ---------------------------------------------------------------------------
# Pure-JAX reference (unpadded, f32, for correctness check)
# ---------------------------------------------------------------------------
def _ref_lstm_dir(x_tm, w_ih, w_hh, b, hidden):
    B = x_tm.shape[1]

    def step(carry, x_t):
        h, c = carry
        gates = x_t @ w_ih + h @ w_hh + b
        i = jax.nn.sigmoid(gates[:, :hidden])
        f = jax.nn.sigmoid(gates[:, hidden:2 * hidden])
        g = jnp.tanh(gates[:, 2 * hidden:3 * hidden])
        o = jax.nn.sigmoid(gates[:, 3 * hidden:])
        c = f * c + i * g
        h = o * jnp.tanh(c)
        return (h, c), h

    h0 = jnp.zeros((B, hidden), jnp.float32)
    c0 = jnp.zeros((B, hidden), jnp.float32)
    _, hs = lax.scan(step, (h0, c0), x_tm)
    return hs


def _ref_bilstm(x, p, hidden):
    x_tm = jnp.transpose(x, (1, 0, 2))
    fwd = _ref_lstm_dir(x_tm, p["w_ih_f"], p["w_hh_f"], p["b_f"], hidden)
    bwd = _ref_lstm_dir(x_tm[::-1], p["w_ih_b"], p["w_hh_b"], p["b_b"], hidden)[::-1]
    return jnp.transpose(jnp.concatenate([fwd, bwd], axis=-1), (1, 0, 2))


def ref_forward(x, params, lstm_hidden):
    B, T, d_in = x.shape
    h = jnp.maximum(x.reshape(B * T, d_in) @ params["fc1_w"] + params["fc1_b"], 0.0)
    h = h.reshape(B, T, -1)
    out1 = _ref_bilstm(h, params["lstm1"], lstm_hidden)
    out2 = _ref_bilstm(out1, params["lstm2"], lstm_hidden)
    return out2[:, -1, :] @ params["fc2_w"] + params["fc2_b"]


# ---------------------------------------------------------------------------
# Deterministic parameter init (PyTorch-style uniform(-k, k))
# ---------------------------------------------------------------------------
def _uniform(key, shape, k):
    return jax.random.uniform(key, shape, jnp.float32, minval=-k, maxval=k)


def init_params(key, input_dim, output_dim, hidden_dim, lstm_hidden):
    keys = iter(jax.random.split(key, 32))

    def lstm_params(d_in):
        k = 1.0 / (lstm_hidden ** 0.5)
        return {
            "w_ih_f": _uniform(next(keys), (d_in, 4 * lstm_hidden), k),
            "w_hh_f": _uniform(next(keys), (lstm_hidden, 4 * lstm_hidden), k),
            "b_f": _uniform(next(keys), (4 * lstm_hidden,), k),
            "w_ih_b": _uniform(next(keys), (d_in, 4 * lstm_hidden), k),
            "w_hh_b": _uniform(next(keys), (lstm_hidden, 4 * lstm_hidden), k),
            "b_b": _uniform(next(keys), (4 * lstm_hidden,), k),
        }

    k1 = 1.0 / (input_dim ** 0.5)
    k2 = 1.0 / ((2 * lstm_hidden) ** 0.5)
    return {
        "fc1_w": _uniform(next(keys), (input_dim, hidden_dim), k1),
        "fc1_b": _uniform(next(keys), (hidden_dim,), k1),
        "lstm1": lstm_params(hidden_dim),
        "lstm2": lstm_params(2 * lstm_hidden),
        "fc2_w": _uniform(next(keys), (2 * lstm_hidden, output_dim), k2),
        "fc2_b": _uniform(next(keys), (output_dim,), k2),
    }


# ---------------------------------------------------------------------------
# Main
# ---------------------------------------------------------------------------
if __name__ == "__main__":
    B = 2
    INPUT_DIM, OUTPUT_DIM = 16, 8
    HIDDEN_DIM, LSTM_HIDDEN = 32, 32

    key = jax.random.PRNGKey(0)
    k_params, k_x = jax.random.split(key)
    params = init_params(k_params, INPUT_DIM, OUTPUT_DIM, HIDDEN_DIM, LSTM_HIDDEN)
    pp = prepare_params(params, INPUT_DIM, HIDDEN_DIM, LSTM_HIDDEN, OUTPUT_DIM)

    # bf16 MXU operands + bf16 intermediates (f32 accumulation / f32 h,c state)
    # loosen parity vs. the pure-f32 reference slightly.
    RTOL = ATOL = 5e-2

    # Case A: T divisible by the recurrence block -> two streamed K2 blocks,
    # scratch-carried h/c state, reversed-block backward direction.
    T = 8
    x = jax.random.normal(k_x, (B, T, INPUT_DIM), jnp.float32)
    out = jax.block_until_ready(nn_bilstm_forward(x, pp, t2_blk=4))
    assert out.shape == (B, OUTPUT_DIM), out.shape
    ref = jax.block_until_ready(ref_forward(x, params, LSTM_HIDDEN))
    diff_a = float(jnp.max(jnp.abs(out - ref)))
    assert jnp.allclose(out, ref, rtol=RTOL, atol=ATOL), f"case A max abs diff {diff_a}"

    # Case B: T=7 (not divisible) -> padded to 8, exercises the masked
    # (frozen-state) padded steps in K2/K4 instead of degrading to t_blk=1.
    x7 = x[:, :7, :]
    out7 = jax.block_until_ready(nn_bilstm_forward(x7, pp, t2_blk=4))
    ref7 = jax.block_until_ready(ref_forward(x7, params, LSTM_HIDDEN))
    diff_b = float(jnp.max(jnp.abs(out7 - ref7)))
    assert jnp.allclose(out7, ref7, rtol=RTOL, atol=ATOL), f"case B max abs diff {diff_b}"

    print("KERNEL_OK")
</pallas_src>

<mosaic_0001>
module attributes {stable_mosaic.version = 11 : i64} {
  func.func @_proj1_kernel(%arg0: i32, %arg1: memref<8x8x128xbf16, #tpu.memory_space<vmem>>, %arg2: memref<128x128xbf16, #tpu.memory_space<vmem>>, %arg3: memref<1x128xf32, #tpu.memory_space<vmem>>, %arg4: memref<128x1024xbf16, #tpu.memory_space<vmem>>, %arg5: memref<1x1024xf32, #tpu.memory_space<vmem>>, %arg6: memref<8x8x1024xbf16, #tpu.memory_space<vmem>>) attributes {dimension_semantics = [#tpu.dimension_semantics<parallel>], iteration_bounds = array<i64: 1>, scalar_prefetch = 0 : i64, scratch_operands = 0 : i64, tpu.core_type = #tpu.core_type<tc>, window_params = [{transform_indices = @transform_0, window_bounds = array<i64: 8, 8, 128>}, {pipeline_mode = #tpu.pipeline_mode<synchronous>, transform_indices = @transform_1, window_bounds = array<i64: 128, 128>}, {pipeline_mode = #tpu.pipeline_mode<synchronous>, transform_indices = @transform_2, window_bounds = array<i64: 1, 128>}, {pipeline_mode = #tpu.pipeline_mode<synchronous>, transform_indices = @transform_3, window_bounds = array<i64: 128, 1024>}, {pipeline_mode = #tpu.pipeline_mode<synchronous>, transform_indices = @transform_4, window_bounds = array<i64: 1, 1024>}, {transform_indices = @transform_5, window_bounds = array<i64: 8, 8, 1024>}]} {
    %c0 = arith.constant 0 : index
    %c0_0 = arith.constant 0 : index
    %c0_1 = arith.constant 0 : index
    %0 = vector.load %arg1[%c0, %c0_0, %c0_1] : memref<8x8x128xbf16, #tpu.memory_space<vmem>>, vector<8x8x128xbf16>
    %1 = vector.shape_cast %0 : vector<8x8x128xbf16> to vector<64x128xbf16>
    %c0_2 = arith.constant 0 : index
    %c0_3 = arith.constant 0 : index
    %2 = vector.load %arg2[%c0_2, %c0_3] : memref<128x128xbf16, #tpu.memory_space<vmem>>, vector<128x128xbf16>
    %cst = arith.constant dense<0.000000e+00> : vector<64x128xf32>
    %3 = tpu.matmul %1, %2, %cst {dimension_numbers = #tpu.dot_dimension_numbers<[1], [0], [0], [1], [0, 0, 1, 1], [], []>} : vector<64x128xbf16>, vector<128x128xbf16>, vector<64x128xf32> -> vector<64x128xf32>
    %c0_4 = arith.constant 0 : index
    %c0_5 = arith.constant 0 : index
    %4 = vector.load %arg3[%c0_4, %c0_5] : memref<1x128xf32, #tpu.memory_space<vmem>>, vector<1x128xf32>
    %5 = vector.broadcast %4 : vector<1x128xf32> to vector<64x128xf32>
    %6 = arith.addf %3, %5 : vector<64x128xf32>
    %cst_6 = arith.constant 0.000000e+00 : f32
    %7 = vector.broadcast %cst_6 : f32 to vector<64x128xf32>
    %8 = arith.maximumf %6, %7 : vector<64x128xf32>
    %9 = arith.truncf %8 : vector<64x128xf32> to vector<64x128xbf16>
    %c0_7 = arith.constant 0 : index
    %c0_8 = arith.constant 0 : index
    %10 = vector.load %arg4[%c0_7, %c0_8] : memref<128x1024xbf16, #tpu.memory_space<vmem>>, vector<128x1024xbf16>
    %cst_9 = arith.constant dense<0.000000e+00> : vector<64x1024xf32>
    %11 = tpu.matmul %9, %10, %cst_9 {dimension_numbers = #tpu.dot_dimension_numbers<[1], [0], [0], [1], [0, 0, 1, 1], [], []>} : vector<64x128xbf16>, vector<128x1024xbf16>, vector<64x1024xf32> -> vector<64x1024xf32>
    %c0_10 = arith.constant 0 : index
    %c0_11 = arith.constant 0 : index
    %12 = vector.load %arg5[%c0_10, %c0_11] : memref<1x1024xf32, #tpu.memory_space<vmem>>, vector<1x1024xf32>
    %13 = vector.broadcast %12 : vector<1x1024xf32> to vector<64x1024xf32>
    %14 = arith.addf %11, %13 : vector<64x1024xf32>
    %15 = vector.shape_cast %14 : vector<64x1024xf32> to vector<8x8x1024xf32>
    %16 = arith.truncf %15 : vector<8x8x1024xf32> to vector<8x8x1024xbf16>
    %c0_12 = arith.constant 0 : index
    %c0_13 = arith.constant 0 : index
    %c0_14 = arith.constant 0 : index
    %17 = vector.load %arg6[%c0_12, %c0_13, %c0_14] : memref<8x8x1024xbf16, #tpu.memory_space<vmem>>, vector<8x8x1024xbf16>
    tpu.vector_store %arg6[%c0_12, %c0_13, %c0_14], %16 {strides = array<i32>} : memref<8x8x1024xbf16, #tpu.memory_space<vmem>>, vector<8x8x1024xbf16>,
    return
  }
  func.func @transform_0(%arg0: i32) -> (i32, i32, i32) {
    %c0_i32 = arith.constant 0 : i32
    %c0_i32_0 = arith.constant 0 : i32
    %c0_i32_1 = arith.constant 0 : i32
    return %arg0, %c0_i32, %c0_i32_0 : i32, i32, i32
  }
  func.func @transform_1(%arg0: i32) -> (i32, i32) {
    %c0_i32 = arith.constant 0 : i32
    %c0_i32_0 = arith.constant 0 : i32
    %c0_i32_1 = arith.constant 0 : i32
    return %c0_i32, %c0_i32_0 : i32, i32
  }
  func.func @transform_2(%arg0: i32) -> (i32, i32) {
    %c0_i32 = arith.constant 0 : i32
    %c0_i32_0 = arith.constant 0 : i32
    %c0_i32_1 = arith.constant 0 : i32
    return %c0_i32, %c0_i32_0 : i32, i32
  }
  func.func @transform_3(%arg0: i32) -> (i32, i32) {
    %c0_i32 = arith.constant 0 : i32
    %c0_i32_0 = arith.constant 0 : i32
    %c0_i32_1 = arith.constant 0 : i32
    return %c0_i32, %c0_i32_0 : i32, i32
  }
  func.func @transform_4(%arg0: i32) -> (i32, i32) {
    %c0_i32 = arith.constant 0 : i32
    %c0_i32_0 = arith.constant 0 : i32
    %c0_i32_1 = arith.constant 0 : i32
    return %c0_i32, %c0_i32_0 : i32, i32
  }
  func.func @transform_5(%arg0: i32) -> (i32, i32, i32) {
    %c0_i32 = arith.constant 0 : i32
    %c0_i32_0 = arith.constant 0 : i32
    %c0_i32_1 = arith.constant 0 : i32
    return %arg0, %c0_i32, %c0_i32_0 : i32, i32, i32
  }
}

</mosaic_0001>

<bundles_post_ra>
// kernel: tpu_custom_call.1
= control target key start
LH: loop header
LB: loop body
LE: loop exit
PB: predicated region body
PF: predicated region fallthrough
CT: control target
= control target key end

     0   :  { %10 = vsyncpa [#allocation3], 0  ;;  %s1857_s0 = inlined_call_operand.hbm [shape: bf16[8,8,128], index: 0, kind: input, shape index: {}]   ;;  %s1858_s1 = inlined_call_operand.hbm [shape: bf16[128,128], index: 1, kind: input, shape index: {}]   ;;  %s1859_s2 = inlined_call_operand.vmem [shape: f32[1,128], index: 2, kind: input, shape index: {}]   ;;  %s1860_s3 = inlined_call_operand.hbm [shape: bf16[128,1024], index: 3, kind: input, shape index: {}]   ;;  %s1861_s4 = inlined_call_operand.vmem [shape: f32[1,1024], index: 4, kind: input, shape index: {}]   ;;  %s1862_s5 = inlined_call_operand.hbm [shape: bf16[8,8,1024], index: 5, kind: output, shape index: {}]  }
   0x1   :  { %11 = vsyncpa [#allocation6], 0 }
   0x2   :  { %12 = vsyncpa [#allocation4], 0  ;;  %s1575_s18 = smov [#allocation5]   ;;  %s1576_s20 = smov [#allocation2]  }
   0x3   :  { %s30_s19 = sshll.u32 %s1575_s18, 4  ;;  %s18_s21 = sshll.u32 %s1576_s20, 4  ;;  %s31_s19 = int_to_ptr.vmem [resolvable:$true] %s30_s19  ;;  %s1614_s21 = int_to_ptr.vmem [resolvable:$true] %s18_s21 }
   0x4   :  { %s1481_s24 = scalar_lea.hbm %s1858_s1, 1024 }
   0x5   :  { %p1482_p0 = scmp.ne.s32.totalorder %s1858_s1, %s1481_s24  ;;  %p1485_p1 = scmp.lt.u32.totalorder %s1481_s24, %s1858_s1 }
   0x7   :  { %p1487_p2 = pnand %p1485_p1, %p1482_p0 }
   0x9   :  { %1490 = shalt.err (!%p1487_p2)
}
   0xa   :  { %s1491_s29 = scalar_lea.vmem %s31_s19, 1024  ;;  %p1496_p4 = scmp.lt.s32.totalorder %s31_s19, %s31_s19 }
   0xb   :  { %p1492_p3 = scmp.ne.s32.totalorder %s31_s19, %s1491_s29  ;;  %p1497_p5 = scmp.lt.s32.totalorder %s1491_s29, %s1491_s29 }
   0xd   :  { %p1498_p6 = por %p1497_p5, %p1496_p4 }
   0xf   :  { %p1499_p7 = pnand %p1498_p6, %p1492_p3 }
  0x11   :  { %1502 = shalt.err (!%p1499_p7)
}
  0x12   :  { %s1577_s30 = smov 64   ;;  %s1578_s6 = smov 4  }
  0x13   :  { %36 = dma.hbm_to_vmem [thread:$0]  %s1858_s1, 1024, %s31_s19, [#allocation6], %s1577_s30, %s1577_s30, %s1578_s6  }
  0x14   :  { %s1503_s11 = scalar_lea.hbm %s1857_s0, 512 }
  0x15   :  { %p1504_p8 = scmp.ne.s32.totalorder %s1857_s0, %s1503_s11  ;;  %p1507_p9 = scmp.lt.u32.totalorder %s1503_s11, %s1857_s0 }
  0x17   :  { %p1509_p10 = pnand %p1507_p9, %p1504_p8 }
  0x19   :  { %1512 = shalt.err (!%p1509_p10)
}
  0x1a   :  { %s1513_s16 = scalar_lea.vmem %s1614_s21, 512  ;;  %p1518_p12 = scmp.lt.s32.totalorder %s1614_s21, %s1614_s21 }
  0x1b   :  { %p1514_p11 = scmp.ne.s32.totalorder %s1614_s21, %s1513_s16  ;;  %p1519_p13 = scmp.lt.s32.totalorder %s1513_s16, %s1513_s16 }
  0x1d   :  { %p1520_p0 = por %p1519_p13, %p1518_p12 }
  0x1f   :  { %p1521_p1 = pnand %p1520_p0, %p1514_p11 }
  0x21   :  { %1524 = shalt.err (!%p1521_p1)
}
  0x22   :  { %24 = dma.hbm_to_vmem [thread:$0]  %s1857_s0, 512, %s1614_s21, [#allocation3], %s1577_s30, %s1577_s30, %s1578_s6  }
  0x23   :  { %s1579_s18 = smov [#allocation7]   ;;  %s1525_s23 = scalar_lea.hbm %s1860_s3, 8192 }
  0x24   :  { %s44_s19 = sshll.u32 %s1579_s18, 4  ;;  %p1526_p2 = scmp.ne.s32.totalorder %s1860_s3, %s1525_s23  ;;  %s45_s19 = int_to_ptr.vmem [resolvable:$true] %s44_s19 }
  0x25   :  { %p1529_p3 = scmp.lt.u32.totalorder %s1525_s23, %s1860_s3 }
  0x27   :  { %p1531_p4 = pnand %p1529_p3, %p1526_p2 }
  0x29   :  { %1534 = shalt.err (!%p1531_p4)
}
  0x2a   :  { %s1535_s28 = scalar_lea.vmem %s45_s19, 8192  ;;  %p1540_p6 = scmp.lt.s32.totalorder %s45_s19, %s45_s19 }
  0x2b   :  { %p1536_p5 = scmp.ne.s32.totalorder %s45_s19, %s1535_s28  ;;  %p1541_p7 = scmp.lt.s32.totalorder %s1535_s28, %s1535_s28 }
  0x2d   :  { %p1542_p8 = por %p1541_p7, %p1540_p6 }
  0x2f   :  { %p1543_p9 = pnand %p1542_p8, %p1536_p5 }
  0x31   :  { %1546 = shalt.err (!%p1543_p9)
}
  0x32   :  { %s1580_s0 = smov 512   ;;  %s1581_s21 = smov 32  }
  0x33   :  { %50 = dma.hbm_to_vmem [thread:$0]  %s1860_s3, 8192, %s45_s19, [#allocation6], %s1580_s0, %s1580_s0, %s1581_s21  }
  0x34   :  { %1569 = dma.done.wait [#allocation3], 512  }
  0x35   :  { %1570 = vsyncadd [#allocation3], 4294966784 }
  0x36   :  { %1571 = dma.done.wait [#allocation6], 9216  }
  0x37   :  { %1572 = vsyncadd [#allocation6], 4294958080  ;;  %v1469_v0 = vld [vmem:[#allocation5] sm:$0xff]   ;;  %v1470_v1 = vld [vmem:[#allocation5 + $0x8] sm:$0xff]  }
  0x38   :  { %1420 = vmatprep.subr.bf16.mxu0 %v1469_v0  ;;  %v1471_v2 = vld [vmem:[#allocation5 + $0x10] sm:$0xff]   ;;  %v1472_v3 = vld [vmem:[#allocation5 + $0x18] sm:$0xff]   ;;  %v1477_v4 = vld [vmem:[#allocation2] sm:$0xff]  }
  0x39   :  { %1421 = vmatpush3.bf16.msra.mxu0 %v1469_v0  ;;  %1436 = vmatprep.mubr.bf16.mxu0 %v1477_v4  ;;  %v1473_v5 = vld [vmem:[#allocation5 + $0x20] sm:$0xff]   ;;  %v1474_v15 = vld [vmem:[#allocation5 + $0x28] sm:$0xff]   ;;  %v1475_v20 = vld [vmem:[#allocation5 + $0x30] sm:$0xff]  }
  0x3a   :  { %1422 = vmatprep.subr.bf16.mxu0 %v1470_v1  ;;  %v243_v6 = vld [vmem:[#allocation7] sm:$0xff]  ;;  %v1476_v25 = vld [vmem:[#allocation5 + $0x38] sm:$0xff]   ;;  %v244_v27 = vld [vmem:[#allocation7 + $0x8] sm:$0xff] }
  0x3b   :  { %v247_v7 = vld [vmem:[#allocation7 + $0x20] sm:$0xff]  ;;  %v248_v28 = vld [vmem:[#allocation7 + $0x28] sm:$0xff]  ;;  %v1479_v38 = vld [vmem:[#allocation2 + $0x10] sm:$0xff]  }
  0x3c   :  { %v1281_v8 = vcombine.high %v243_v6, %v247_v7  ;;  %v1280_v9 = vcombine.low %v243_v6, %v247_v7  ;;  %v251_v10 = vld [vmem:[#allocation7 + $0x40] sm:$0xff]  ;;  %v1283_v32 = vcombine.high %v244_v27, %v248_v28  ;;  %v252_v34 = vld [vmem:[#allocation7 + $0x48] sm:$0xff]  ;;  %v1282_v39 = vcombine.low %v244_v27, %v248_v28  ;;  %v1480_v48 = vld [vmem:[#allocation2 + $0x18] sm:$0xff]  }
  0x3d   :  { %1423 = vmatpush3.bf16.msra.mxu0 %v1470_v1  ;;  %v255_v11 = vld [vmem:[#allocation7 + $0x60] sm:$0xff]  ;;  %v256_v35 = vld [vmem:[#allocation7 + $0x68] sm:$0xff] }
  0x3e   :  { %1424 = vmatprep.subr.bf16.mxu0 %v1471_v2  ;;  %v1289_v12 = vcombine.high %v251_v10, %v255_v11  ;;  %v259_v13 = vld [vmem:[#allocation7 + $0x80] sm:$0xff]  ;;  %669 = vmatprep.subr.bf16.mxu1 %v1281_v8  ;;  %v1288_v16 = vcombine.low %v251_v10, %v255_v11  ;;  %v1478_v37 = vld [vmem:[#allocation2 + $0x8] sm:$0xff]   ;;  %v1291_v40 = vcombine.high %v252_v34, %v256_v35 }
  0x3f   :  { %v263_v14 = vld [vmem:[#allocation7 + $0xa0] sm:$0xff]  ;;  %670 = vmatpush1.bf16.msra.mxu1 %v1280_v9  ;;  %v260_v42 = vld [vmem:[#allocation7 + $0x88] sm:$0xff]  ;;  %v1290_v44 = vcombine.low %v252_v34, %v256_v35  ;;  %v254_v34 = vld [vmem:[#allocation7 + $0x58] sm:$0xff] }
  0x40   :  { %671 = vmatprep.subr.bf16.mxu1 %v1289_v12  ;;  %v1297_v17 = vcombine.high %v259_v13, %v263_v14  ;;  %v267_v18 = vld [vmem:[#allocation7 + $0xc0] sm:$0xff]  ;;  %v1296_v21 = vcombine.low %v259_v13, %v263_v14  ;;  %v264_v43 = vld [vmem:[#allocation7 + $0xa8] sm:$0xff]  ;;  %v245_v12 = vld [vmem:[#allocation7 + $0x10] sm:$0xff] }
  0x41   :  { %1425 = vmatpush3.bf16.msra.mxu0 %v1471_v2  ;;  %v271_v19 = vld [vmem:[#allocation7 + $0xe0] sm:$0xff]  ;;  %v1299_v45 = vcombine.high %v260_v42, %v264_v43  ;;  %v268_v46 = vld [vmem:[#allocation7 + $0xc8] sm:$0xff]  ;;  %v1298_v49 = vcombine.low %v260_v42, %v264_v43  ;;  %v249_v13 = vld [vmem:[#allocation7 + $0x30] sm:$0xff] }
  0x42   :  { %1426 = vmatprep.subr.bf16.mxu0 %v1472_v3  ;;  %v1305_v22 = vcombine.high %v267_v18, %v271_v19  ;;  %v275_v23 = vld [vmem:[#allocation7 + $0x100] sm:$0xff]  ;;  %v1304_v26 = vcombine.low %v267_v18, %v271_v19  ;;  %v272_v47 = vld [vmem:[#allocation7 + $0xe8] sm:$0xff]  ;;  %v246_v14 = vld [vmem:[#allocation7 + $0x18] sm:$0xff]  ;;  %v1582_v18 = vmov 0  }
  0x43   :  { %672 = vmatpush1.bf16.msra.mxu1 %v1288_v16  ;;  %v279_v24 = vld [vmem:[#allocation7 + $0x120] sm:$0xff]  ;;  %v1307_v50 = vcombine.high %v268_v46, %v272_v47  ;;  %v276_v51 = vld [vmem:[#allocation7 + $0x108] sm:$0xff]  ;;  %v1306_v53 = vcombine.low %v268_v46, %v272_v47  ;;  %v1285_v16 = vcombine.high %v245_v12, %v249_v13  ;;  %701 = vmatprep.mubr.bf16.mxu1 %v1582_v18  ;;  %v258_v35 = vld [vmem:[#allocation7 + $0x78] sm:$0xff] }
  0x44   :  { %673 = vmatprep.subr.bf16.mxu1 %v1297_v17  ;;  %v1313_v29 = vcombine.high %v275_v23, %v279_v24  ;;  %v283_v30 = vld [vmem:[#allocation7 + $0x140] sm:$0xff]  ;;  %v1312_v33 = vcombine.low %v275_v23, %v279_v24  ;;  %v280_v52 = vld [vmem:[#allocation7 + $0x128] sm:$0xff]  ;;  %v250_v17 = vld [vmem:[#allocation7 + $0x38] sm:$0xff]  ;;  %v1674_v42 = vcombine.high %v254_v34, %v258_v35 }
  0x45   :  { %1427 = vmatpush3.bf16.msra.mxu0 %v1472_v3  ;;  %v287_v31 = vld [vmem:[#allocation7 + $0x160] sm:$0xff]  ;;  %v1315_v54 = vcombine.high %v276_v51, %v280_v52  ;;  %v284_v55 = vld [vmem:[#allocation7 + $0x148] sm:$0xff]  ;;  %v1314_v57 = vcombine.low %v276_v51, %v280_v52  ;;  %v1662_v19 = vcombine.low %v246_v14, %v250_v17  ;;  %v261_v43 = vld [vmem:[#allocation7 + $0x90] sm:$0xff] }
  0x46   :  { %1428 = vmatprep.subr.bf16.mxu0 %v1473_v5  ;;  %v1321_v36 = vcombine.high %v283_v30, %v287_v31  ;;  %v1320_v41 = vcombine.low %v283_v30, %v287_v31  ;;  %v288_v56 = vld [vmem:[#allocation7 + $0x168] sm:$0xff]  ;;  %v291_v60 = vld [vmem:[#allocation7 + $0x180] sm:$0xff]  ;;  %v253_v30 = vld [vmem:[#allocation7 + $0x50] sm:$0xff] }
  0x47   :  { %674 = vmatpush1.bf16.msra.mxu1 %v1296_v21  ;;  %v1323_v58 = vcombine.high %v284_v55, %v288_v56  ;;  %v1322_v59 = vcombine.low %v284_v55, %v288_v56  ;;  %v295_v61 = vld [vmem:[#allocation7 + $0x1a0] sm:$0xff]  ;;  %v292_v62 = vld [vmem:[#allocation7 + $0x188] sm:$0xff]  ;;  %v265_v46 = vld [vmem:[#allocation7 + $0xb0] sm:$0xff] }
  0x48   :  { %675 = vmatprep.subr.bf16.mxu1 %v1305_v22  ;;  %v1329_v63 = vcombine.high %v291_v60, %v295_v61  ;;  %v296_v0 = vld [vmem:[#allocation7 + $0x1a8] sm:$0xff]  ;;  %v1328_v1 = vcombine.low %v291_v60, %v295_v61  ;;  %v299_v4 = vld [vmem:[#allocation7 + $0x1c0] sm:$0xff]  ;;  %v262_v47 = vld [vmem:[#allocation7 + $0x98] sm:$0xff] }
  0x49   :  { %1429 = vmatpush3.bf16.msra.mxu0 %v1473_v5  ;;  %v1330_v2 = vcombine.low %v292_v62, %v296_v0  ;;  %v1331_v3 = vcombine.high %v292_v62, %v296_v0  ;;  %v303_v5 = vld [vmem:[#allocation7 + $0x1e0] sm:$0xff]  ;;  %v300_v6 = vld [vmem:[#allocation7 + $0x1c8] sm:$0xff]  ;;  %v269_v60 = vld [vmem:[#allocation7 + $0xd0] sm:$0xff] }
  0x4a   :  { %1430 = vmatprep.subr.bf16.mxu0 %v1474_v15  ;;  %v1337_v7 = vcombine.high %v299_v4, %v303_v5  ;;  %v304_v8 = vld [vmem:[#allocation7 + $0x1e8] sm:$0xff]  ;;  %v1336_v9 = vcombine.low %v299_v4, %v303_v5  ;;  %v1267_v21 = vld [vmem:[%s1859_s2] ss:$0 sm:$0xff]  ;;  %v273_v62 = vld [vmem:[#allocation7 + $0xf0] sm:$0xff] }
  0x4b   :  { %676 = vmatpush1.bf16.msra.mxu1 %v1304_v26  ;;  %v1338_v10 = vcombine.low %v300_v6, %v304_v8  ;;  %v1339_v11 = vcombine.high %v300_v6, %v304_v8  ;;  %v274_v0 = vld [vmem:[#allocation7 + $0xf8] sm:$0xff]  ;;  %v1309_v6 = vcombine.high %v269_v60, %v273_v62  ;;  %v277_v8 = vld [vmem:[#allocation7 + $0x110] sm:$0xff] }
  0x4c   :  { %677 = vmatprep.subr.bf16.mxu1 %v1313_v29 }
  0x4d   :  { %1431 = vmatpush3.bf16.msra.mxu0 %v1474_v15  ;;  %v1284_v15 = vcombine.low %v245_v12, %v249_v13  ;;  %v1308_v12 = vcombine.low %v269_v60, %v273_v62 }
  0x4e   :  { %1432 = vmatprep.subr.bf16.mxu0 %v1475_v20 }
  0x4f   :  { %678 = vmatpush1.bf16.msra.mxu1 %v1312_v33  ;;  %v257_v33 = vld [vmem:[#allocation7 + $0x70] sm:$0xff] }
  0x50   :  { %679 = vmatprep.subr.bf16.mxu1 %v1321_v36  ;;  %v1292_v52 = vcombine.low %v253_v30, %v257_v33 }
  0x51   :  { %1433 = vmatpush3.bf16.msra.mxu0 %v1475_v20  ;;  %v1664_v20 = vcombine.high %v246_v14, %v250_v17  ;;  %v289_v17 = vld [vmem:[#allocation7 + $0x170] sm:$0xff] }
  0x52   :  { %1434 = vmatprep.subr.bf16.mxu0 %v1476_v25 }
  0x53   :  { %680 = vmatpush1.bf16.msra.mxu1 %v1320_v41  ;;  %v1293_v41 = vcombine.high %v253_v30, %v257_v33  ;;  %v298_v30 = vld [vmem:[#allocation7 + $0x1b8] sm:$0xff] }
  0x54   :  { %681 = vmatprep.subr.bf16.mxu1 %v1329_v63  ;;  %v270_v63 = vld [vmem:[#allocation7 + $0xd8] sm:$0xff] }
  0x55   :  { %1435 = vmatpush3.bf16.msra.mxu0 %v1476_v25  ;;  %v1699_v13 = vcombine.low %v270_v63, %v274_v0 }
  0x56   :  { %742 = vmatprep.subr.bf16.mxu0 %v1283_v32 }
  0x57   :  { %682 = vmatpush1.bf16.msra.mxu1 %v1328_v1 }
  0x58   :  { %1437 = vmatmul.mubr.bf16.vlgmr.msra.gmra.mrb[0].mxu0 %v1478_v37  ;;  %683 = vmatprep.subr.bf16.mxu1 %v1337_v7  ;;  %v1694_v7 = vcombine.high %v270_v63, %v274_v0 }
  0x59   :  { %1440 = vmatprep.mubr.bf16.mxu0 %v1479_v38  ;;  %743 = vmatpush1.bf16.msra.mxu0 %v1282_v39 }
  0x5a   :  { %744 = vmatprep.subr.bf16.mxu0 %v1291_v40 }
  0x5b   :  { %684 = vmatpush1.bf16.msra.mxu1 %v1336_v9  ;;  %v281_v9 = vld [vmem:[#allocation7 + $0x130] sm:$0xff] }
  0x5c   :  { %815 = vmatprep.subr.bf16.mxu1 %v1285_v16  ;;  %v1317_v14 = vcombine.high %v277_v8, %v281_v9  ;;  %v285_v16 = vld [vmem:[#allocation7 + $0x150] sm:$0xff] }
  0x5d   :  { %745 = vmatpush1.bf16.msra.mxu0 %v1290_v44 }
  0x5e   :  { %746 = vmatprep.subr.bf16.mxu0 %v1299_v45 }
  0x60   :  { %1441 = vmatmul.mubr.bf16.gmra.mrb[4].mxu0 %v1480_v48  ;;  %v266_v48 = vld [vmem:[#allocation7 + $0xb8] sm:$0xff] }
  0x61   :  { %747 = vmatpush1.bf16.msra.mxu0 %v1298_v49  ;;  %774 = vmatprep.mubr.bf16.mxu0 %v1582_v18  ;;  %v1689_v4 = vcombine.low %v262_v47, %v266_v48 }
  0x62   :  { %748 = vmatprep.subr.bf16.mxu0 %v1307_v50 }
  0x65   :  { %749 = vmatpush1.bf16.msra.mxu0 %v1306_v53  ;;  %v1679_v53 = vcombine.low %v254_v34, %v258_v35  ;;  %v301_v35 = vld [vmem:[#allocation7 + $0x1d0] sm:$0xff] }
  0x66   :  { %750 = vmatprep.subr.bf16.mxu0 %v1315_v54 }
  0x69   :  { %751 = vmatpush1.bf16.msra.mxu0 %v1314_v57 }
  0x6a   :  { %752 = vmatprep.subr.bf16.mxu0 %v1323_v58  ;;  %v1301_v58 = vcombine.high %v261_v43, %v265_v46 }
  0x6d   :  { %753 = vmatpush1.bf16.msra.mxu0 %v1322_v59  ;;  %v1682_v59 = vcombine.high %v262_v47, %v266_v48 }
  0x6e   :  { %754 = vmatprep.subr.bf16.mxu0 %v1331_v3  ;;  %v1300_v3 = vcombine.low %v261_v43, %v265_v46 }
  0x71   :  { %755 = vmatpush1.bf16.msra.mxu0 %v1330_v2 }
  0x72   :  { %756 = vmatprep.subr.bf16.mxu0 %v1339_v11  ;;  %v282_v11 = vld [vmem:[#allocation7 + $0x138] sm:$0xff] }
  0x75   :  { %757 = vmatpush1.bf16.msra.mxu0 %v1338_v10  ;;  %v278_v10 = vld [vmem:[#allocation7 + $0x118] sm:$0xff] }
  0x76   :  { %888 = vmatprep.subr.bf16.mxu0 %v1664_v20 }
 0x12b   :  { %v1438_v22 = vpop.f32.mrb[0].mxu0 }
 0x12c   :  { %v209_v23 = vadd.f32 %v1438_v22, %v1267_v21  ;;  %v200_v24 = vpop.f32.mrb[1].mxu0  ;;  %v290_v22 = vld [vmem:[#allocation7 + $0x178] sm:$0xff] }
 0x12d   :  { %v201_v25 = vadd.f32 %v1267_v21, %v200_v24  ;;  %v1439_v26 = vpop.f32.mrb[2].mxu0  ;;  %v1318_v24 = vcombine.low %v278_v10, %v282_v11 }
 0x12e   :  { %v212_v27 = vadd.f32 %v1439_v26, %v1267_v21  ;;  %v203_v28 = vpop.f32.mrb[3].mxu0  ;;  %v233_v31 = vmax.f32 %v209_v23, 0.0  ;;  %v1316_v23 = vcombine.low %v277_v8, %v281_v9 }
 0x12f   :  { %v204_v29 = vadd.f32 %v1267_v21, %v203_v28  ;;  %v231_v36 = vmax.f32 %v201_v25, 0.0  ;;  %v1325_v25 = vcombine.high %v285_v16, %v289_v17  ;;  %v297_v28 = vld [vmem:[#allocation7 + $0x1b0] sm:$0xff] }
 0x130   :  { %v234_v32 = vmax.f32 %v212_v27, 0.0  ;;  %v293_v27 = vld [vmem:[#allocation7 + $0x190] sm:$0xff] }
 0x131   :  { %v232_v37 = vmax.f32 %v204_v29, 0.0  ;;  %v294_v29 = vld [vmem:[#allocation7 + $0x198] sm:$0xff]  ;;  %v1333_v33 = vcombine.high %v293_v27, %v297_v28 }
 0x132   :  { %v1670_v38 = vpack.c.bf16 %v234_v32, %v233_v31  ;;  %v1324_v31 = vcombine.low %v285_v16, %v289_v17  ;;  %v1335_v34 = vcombine.high %v294_v29, %v298_v30  ;;  %v1334_v43 = vcombine.low %v294_v29, %v298_v30 }
 0x133   :  { %v1672_v39 = vpack.c.bf16 %v232_v37, %v231_v36  ;;  %v1442_v40 = vpop.f32.mrb[4].mxu0  ;;  %v305_v36 = vld [vmem:[#allocation7 + $0x1f0] sm:$0xff]  ;;  %v302_v37 = vld [vmem:[#allocation7 + $0x1d8] sm:$0xff] }
 0x134   :  { %v225_v44 = vadd.f32 %v1442_v40, %v1267_v21  ;;  %v216_v45 = vpop.f32.mrb[5].mxu0  ;;  %v306_v40 = vld [vmem:[#allocation7 + $0x1f8] sm:$0xff]  ;;  %v1340_v46 = vcombine.low %v301_v35, %v305_v36 }
 0x135   :  { %702 = vmatmul.mubr.bf16.vlgmr.msra.gmra.mrb[0].mxu1 %v1672_v39  ;;  %775 = vmatmul.mubr.bf16.vlgmr.msra.gmra.mrb[8].mxu0 %v1672_v39  ;;  %v217_v49 = vadd.f32 %v1267_v21, %v216_v45  ;;  %v1443_v50 = vpop.f32.mrb[6].mxu0  ;;  %v1343_v45 = vcombine.high %v302_v37, %v306_v40  ;;  %v1342_v47 = vcombine.low %v302_v37, %v306_v40 }
 0x136   :  { %816 = vmatpush1.bf16.msra.mxu1 %v1284_v15  ;;  %889 = vmatpush1.bf16.msra.mxu0 %v1662_v19  ;;  %v237_v51 = vmax.f32 %v225_v44, 0.0  ;;  %v228_v54 = vadd.f32 %v1443_v50, %v1267_v21  ;;  %v219_v55 = vpop.f32.mrb[7].mxu0  ;;  %v1702_v15 = vcombine.high %v278_v10, %v282_v11  ;;  %v1341_v44 = vcombine.high %v301_v35, %v305_v36 }
 0x137   :  { %817 = vmatprep.subr.bf16.mxu1 %v1293_v41  ;;  %v235_v56 = vmax.f32 %v217_v49, 0.0  ;;  %890 = vmatprep.subr.bf16.mxu0 %v1674_v42  ;;  %v220_v57 = vadd.f32 %v1267_v21, %v219_v55  ;;  %v286_v21 = vld [vmem:[#allocation7 + $0x158] sm:$0xff]  ;;  %v1332_v41 = vcombine.low %v293_v27, %v297_v28 }
 0x138   :  { %v238_v61 = vmax.f32 %v228_v54, 0.0  ;;  %711 = vmatprep.mubr.bf16.mxu1 %v1582_v18  ;;  %784 = vmatprep.mubr.bf16.mxu0 %v1582_v18  ;;  %v1327_v26 = vcombine.high %v286_v21, %v290_v22  ;;  %v1326_v32 = vcombine.low %v286_v21, %v290_v22 }
 0x139   :  { %v236_v1 = vmax.f32 %v220_v57, 0.0 }
 0x13a   :  { %818 = vmatpush1.bf16.msra.mxu1 %v1292_v52  ;;  %v1686_v2 = vpack.c.bf16 %v238_v61, %v237_v51  ;;  %891 = vmatpush1.bf16.msra.mxu0 %v1679_v53 }
 0x13b   :  { %v1691_v5 = vpack.c.bf16 %v236_v1, %v235_v56  ;;  %819 = vmatprep.subr.bf16.mxu1 %v1301_v58  ;;  %892 = vmatprep.subr.bf16.mxu0 %v1682_v59 }
 0x13d   :  { %712 = vmatmul.mubr.bf16.gmra.mrb[4].mxu1 %v1670_v38  ;;  %785 = vmatmul.mubr.bf16.gmra.mrb[12].mxu0 %v1670_v38 }
 0x13e   :  { %820 = vmatpush1.bf16.msra.mxu1 %v1300_v3  ;;  %893 = vmatpush1.bf16.msra.mxu0 %v1689_v4 }
 0x13f   :  { %821 = vmatprep.subr.bf16.mxu1 %v1309_v6  ;;  %894 = vmatprep.subr.bf16.mxu0 %v1694_v7 }
 0x140   :  { %721 = vmatprep.mubr.bf16.mxu1 %v1582_v18  ;;  %794 = vmatprep.mubr.bf16.mxu0 %v1582_v18 }
 0x142   :  { %822 = vmatpush1.bf16.msra.mxu1 %v1308_v12  ;;  %895 = vmatpush1.bf16.msra.mxu0 %v1699_v13 }
 0x143   :  { %823 = vmatprep.subr.bf16.mxu1 %v1317_v14  ;;  %896 = vmatprep.subr.bf16.mxu0 %v1702_v15 }
 0x145   :  { %722 = vmatmul.mubr.bf16.gmra.mrb[8].mxu1 %v1691_v5  ;;  %795 = vmatmul.mubr.bf16.gmra.mrb[16].mxu0 %v1691_v5 }
 0x146   :  { %824 = vmatpush1.bf16.msra.mxu1 %v1316_v23  ;;  %897 = vmatpush1.bf16.msra.mxu0 %v1318_v24 }
 0x147   :  { %825 = vmatprep.subr.bf16.mxu1 %v1325_v25  ;;  %898 = vmatprep.subr.bf16.mxu0 %v1327_v26 }
 0x148   :  { %731 = vmatprep.mubr.bf16.mxu1 %v1582_v18  ;;  %804 = vmatprep.mubr.bf16.mxu0 %v1582_v18 }
 0x14a   :  { %826 = vmatpush1.bf16.msra.mxu1 %v1324_v31  ;;  %899 = vmatpush1.bf16.msra.mxu0 %v1326_v32 }
 0x14b   :  { %827 = vmatprep.subr.bf16.mxu1 %v1333_v33  ;;  %900 = vmatprep.subr.bf16.mxu0 %v1335_v34 }
 0x14d   :  { %732 = vmatmul.mubr.bf16.gmra.mrb[12].mxu1 %v1686_v2  ;;  %805 = vmatmul.mubr.bf16.gmra.mrb[20].mxu0 %v1686_v2 }
 0x14e   :  { %828 = vmatpush1.bf16.msra.mxu1 %v1332_v41  ;;  %901 = vmatpush1.bf16.msra.mxu0 %v1334_v43 }
 0x14f   :  { %829 = vmatprep.subr.bf16.mxu1 %v1341_v44  ;;  %902 = vmatprep.subr.bf16.mxu0 %v1343_v45 }
 0x150   :  { %847 = vmatprep.mubr.bf16.mxu1 %v1582_v18  ;;  %920 = vmatprep.mubr.bf16.mxu0 %v1582_v18 }
 0x152   :  { %830 = vmatpush1.bf16.msra.mxu1 %v1340_v46  ;;  %903 = vmatpush1.bf16.msra.mxu0 %v1342_v47 }
 0x153   :  { %1444 = vmatprep.subr.bf16.mxu1 %v1664_v20 }
 0x155   :  { %848 = vmatmul.mubr.bf16.vlgmr.msra.gmra.mrb[16].mxu1 %v1672_v39  ;;  %921 = vmatmul.mubr.bf16.vlgmr.msra.gmra.mrb[24].mxu0 %v1672_v39 }
 0x156   :  { %1452 = vmatpush1.bf16.msra.mxu1 %v1662_v19  ;;  %857 = vmatprep.mubr.bf16.mxu1 %v1582_v18  ;;  %v309_v19 = vlaneseq }
 0x157   :  { %1445 = vmatprep.subr.bf16.mxu1 %v1674_v42  ;;  %930 = vmatprep.mubr.bf16.mxu0 %v1582_v18  ;;  %v1746_v42 = vld [vmem:[%s1861_s4] sm:$0xff]  ;;  %s1583_s4 = smov [#allocation8]  }
 0x158   :  { %v1739_v20 = vshrl.u32 %v309_v19, 7  ;;  %s1254_s8 = sshll.u32 %s1583_s4, 4  ;;  %s1255_s8 = int_to_ptr.vmem [resolvable:$true] %s1254_s8 }
 0x159   :  { %s1547_s9 = scalar_lea.vmem %s1255_s8, 4096  ;;  %p1552_p11 = scmp.lt.s32.totalorder %s1255_s8, %s1255_s8 }
 0x15a   :  { %1453 = vmatpush1.bf16.msra.mxu1 %v1679_v53  ;;  %v319_v39 = vsub.s32 2, %v1739_v20  ;;  %v315_v48 = vsub.s32 1, %v1739_v20  ;;  %v323_v49 = vsub.s32 3, %v1739_v20  ;;  %p1548_p10 = scmp.ne.s32.totalorder %s1255_s8, %s1547_s9  ;;  %p1553_p12 = scmp.lt.s32.totalorder %s1547_s9, %s1547_s9 }
 0x15b   :  { %1446 = vmatprep.subr.bf16.mxu1 %v1682_v59 }
 0x15c   :  { %v1754_v50 = vrot.slane %v1746_v42, %v319_v39  ;;  %v1757_v51 = vrot.slane %v1746_v42, %v315_v48  ;;  %v1760_v52 = vrot.slane %v1746_v42, %v323_v49  ;;  %p1554_p13 = por %p1553_p12, %p1552_p11 }
 0x15d   :  { %858 = vmatmul.mubr.bf16.gmra.mrb[20].mxu1 %v1670_v38  ;;  %931 = vmatmul.mubr.bf16.gmra.mrb[28].mxu0 %v1670_v38  ;;  %v311_v38 = vsub.s32 0, %v1739_v20 }
 0x15e   :  { %1454 = vmatpush1.bf16.msra.mxu1 %v1689_v4  ;;  %867 = vmatprep.mubr.bf16.mxu1 %v1582_v18  ;;  %p1555_p0 = pnand %p1554_p13, %p1548_p10 }
 0x15f   :  { %1447 = vmatprep.subr.bf16.mxu1 %v1694_v7 }
 0x162   :  { %1455 = vmatpush1.bf16.msra.mxu1 %v1699_v13 }
 0x163   :  { %1448 = vmatprep.subr.bf16.mxu1 %v1702_v15 }
 0x165   :  { %868 = vmatmul.mubr.bf16.gmra.mrb[24].mxu1 %v1691_v5 }
 0x166   :  { %1456 = vmatpush1.bf16.msra.mxu1 %v1318_v24  ;;  %877 = vmatprep.mubr.bf16.mxu1 %v1582_v18 }
 0x167   :  { %1449 = vmatprep.subr.bf16.mxu1 %v1327_v26 }
 0x16a   :  { %1457 = vmatpush1.bf16.msra.mxu1 %v1326_v32 }
 0x16b   :  { %1450 = vmatprep.subr.bf16.mxu1 %v1335_v34 }
 0x16d   :  { %878 = vmatmul.mubr.bf16.gmra.mrb[28].mxu1 %v1686_v2 }
 0x16e   :  { %1458 = vmatpush1.bf16.msra.mxu1 %v1334_v43  ;;  %940 = vmatprep.mubr.bf16.mxu1 %v1582_v18 }
 0x16f   :  { %1451 = vmatprep.subr.bf16.mxu1 %v1343_v45 }
 0x172   :  { %1459 = vmatpush1.bf16.msra.mxu1 %v1342_v47 }
 0x175   :  { %941 = vmatmul.mubr.bf16.vlgmr.msra.gmra.mrb[32].mxu1 %v1691_v5 }
 0x176   :  { %950 = vmatprep.mubr.bf16.mxu1 %v1582_v18  ;;  %v1751_v18 = vrot.slane %v1746_v42, %v311_v38 }
 0x17d   :  { %951 = vmatmul.mubr.bf16.gmra.mrb[36].mxu1 %v1686_v2 }
 0x208   :  { %v703_v53 = vpop.f32.mrb[0].mxu1  ;;  %v776_v54 = vpop.f32.mrb[8].mxu0 }
 0x209   :  { %v704_v55 = vadd.f32 %v703_v53, %v1751_v18  ;;  %v777_v56 = vadd.f32 %v776_v54, %v1754_v50  ;;  %v705_v57 = vpop.f32.mrb[1].mxu1  ;;  %v778_v58 = vpop.f32.mrb[9].mxu0 }
 0x20a   :  { %v706_v59 = vadd.f32 %v705_v57, %v1757_v51  ;;  %v779_v60 = vadd.f32 %v778_v58, %v1760_v52  ;;  %v707_v61 = vpop.f32.mrb[2].mxu1  ;;  %v780_v62 = vpop.f32.mrb[10].mxu0 }
 0x20b   :  { %v708_v63 = vadd.f32 %v707_v61, %v1751_v18  ;;  %v781_v0 = vadd.f32 %v780_v62, %v1754_v50  ;;  %v709_v1 = vpop.f32.mrb[3].mxu1  ;;  %v782_v2 = vpop.f32.mrb[11].mxu0  ;;  %v327_v61 = vsub.s32 4, %v1739_v20  ;;  %v335_v62 = vsub.s32 6, %v1739_v20 }
 0x20c   :  { %v1376_v3 = vpack.c.bf16 %v706_v59, %v704_v55  ;;  %v1377_v4 = vpack.c.bf16 %v779_v60, %v777_v56  ;;  %v710_v5 = vadd.f32 %v709_v1, %v1757_v51  ;;  %v783_v6 = vadd.f32 %v782_v2, %v1760_v52 }
 0x20e   :  { %1217 = vst [vmem:[#allocation8] sm:$0xff] %v1376_v3  ;;  %1218 = vst [vmem:[#allocation8 + $0x8] sm:$0xff] %v1377_v4  ;;  %v1380_v7 = vpack.c.bf16 %v710_v5, %v708_v63  ;;  %v1381_v8 = vpack.c.bf16 %v783_v6, %v781_v0  ;;  %v331_v3 = vsub.s32 5, %v1739_v20  ;;  %v339_v4 = vsub.s32 7, %v1739_v20 }
 0x210   :  { %1221 = vst [vmem:[#allocation8 + $0x20] sm:$0xff] %v1380_v7  ;;  %1222 = vst [vmem:[#allocation8 + $0x28] sm:$0xff] %v1381_v8  ;;  %v713_v9 = vpop.f32.mrb[4].mxu1  ;;  %v786_v10 = vpop.f32.mrb[12].mxu0 }
 0x211   :  { %v714_v11 = vadd.f32 %v713_v9, %v1751_v18  ;;  %v787_v12 = vadd.f32 %v786_v10, %v1754_v50  ;;  %v715_v13 = vpop.f32.mrb[5].mxu1  ;;  %v788_v14 = vpop.f32.mrb[13].mxu0 }
 0x212   :  { %v716_v15 = vadd.f32 %v715_v13, %v1757_v51  ;;  %v789_v16 = vadd.f32 %v788_v14, %v1760_v52  ;;  %v717_v17 = vpop.f32.mrb[6].mxu1  ;;  %v790_v21 = vpop.f32.mrb[14].mxu0  ;;  %v1799_v13 = vrot.slane %v1746_v42, %v327_v61  ;;  %v1802_v14 = vrot.slane %v1746_v42, %v335_v62 }
 0x213   :  { %v718_v22 = vadd.f32 %v717_v17, %v1751_v18  ;;  %v791_v23 = vadd.f32 %v790_v21, %v1754_v50  ;;  %v719_v24 = vpop.f32.mrb[7].mxu1  ;;  %v792_v25 = vpop.f32.mrb[15].mxu0 }
 0x214   :  { %v1384_v26 = vpack.c.bf16 %v716_v15, %v714_v11  ;;  %v1385_v27 = vpack.c.bf16 %v789_v16, %v787_v12  ;;  %v720_v28 = vadd.f32 %v719_v24, %v1757_v51  ;;  %v793_v29 = vadd.f32 %v792_v25, %v1760_v52 }
 0x215   :  { %v1808_v15 = vrot.slane %v1746_v42, %v339_v4 }
 0x216   :  { %1225 = vst [vmem:[#allocation8 + $0x40] sm:$0xff] %v1384_v26  ;;  %1226 = vst [vmem:[#allocation8 + $0x48] sm:$0xff] %v1385_v27  ;;  %v1388_v30 = vpack.c.bf16 %v720_v28, %v718_v22  ;;  %v1389_v31 = vpack.c.bf16 %v793_v29, %v791_v23 }
 0x218   :  { %1229 = vst [vmem:[#allocation8 + $0x60] sm:$0xff] %v1388_v30  ;;  %1230 = vst [vmem:[#allocation8 + $0x68] sm:$0xff] %v1389_v31  ;;  %v723_v32 = vpop.f32.mrb[8].mxu1  ;;  %v796_v33 = vpop.f32.mrb[16].mxu0 }
 0x219   :  { %v724_v34 = vadd.f32 %v723_v32, %v1751_v18  ;;  %v797_v35 = vadd.f32 %v796_v33, %v1754_v50  ;;  %v725_v36 = vpop.f32.mrb[9].mxu1  ;;  %v798_v37 = vpop.f32.mrb[17].mxu0 }
 0x21a   :  { %v726_v40 = vadd.f32 %v725_v36, %v1757_v51  ;;  %v799_v41 = vadd.f32 %v798_v37, %v1760_v52  ;;  %v727_v43 = vpop.f32.mrb[10].mxu1  ;;  %v800_v44 = vpop.f32.mrb[18].mxu0 }
 0x21b   :  { %v728_v45 = vadd.f32 %v727_v43, %v1751_v18  ;;  %v801_v46 = vadd.f32 %v800_v44, %v1754_v50  ;;  %v729_v47 = vpop.f32.mrb[11].mxu1  ;;  %v802_v19 = vpop.f32.mrb[19].mxu0 }
 0x21c   :  { %v1392_v38 = vpack.c.bf16 %v726_v40, %v724_v34  ;;  %v1393_v39 = vpack.c.bf16 %v799_v41, %v797_v35  ;;  %v730_v48 = vadd.f32 %v729_v47, %v1757_v51  ;;  %v803_v49 = vadd.f32 %v802_v19, %v1760_v52 }
 0x21e   :  { %1233 = vst [vmem:[#allocation8 + $0x80] sm:$0xff] %v1392_v38  ;;  %1234 = vst [vmem:[#allocation8 + $0x88] sm:$0xff] %v1393_v39  ;;  %v1396_v53 = vpack.c.bf16 %v730_v48, %v728_v45  ;;  %v1397_v54 = vpack.c.bf16 %v803_v49, %v801_v46 }
 0x220   :  { %1237 = vst [vmem:[#allocation8 + $0xa0] sm:$0xff] %v1396_v53  ;;  %1238 = vst [vmem:[#allocation8 + $0xa8] sm:$0xff] %v1397_v54  ;;  %v733_v55 = vpop.f32.mrb[12].mxu1  ;;  %v806_v56 = vpop.f32.mrb[20].mxu0 }
 0x221   :  { %v734_v57 = vadd.f32 %v733_v55, %v1751_v18  ;;  %v807_v58 = vadd.f32 %v806_v56, %v1754_v50  ;;  %v735_v59 = vpop.f32.mrb[13].mxu1  ;;  %v808_v60 = vpop.f32.mrb[21].mxu0 }
 0x222   :  { %v736_v63 = vadd.f32 %v735_v59, %v1757_v51  ;;  %v809_v0 = vadd.f32 %v808_v60, %v1760_v52  ;;  %v737_v1 = vpop.f32.mrb[14].mxu1  ;;  %v810_v2 = vpop.f32.mrb[22].mxu0 }
 0x223   :  { %v738_v5 = vadd.f32 %v737_v1, %v1751_v18  ;;  %v811_v6 = vadd.f32 %v810_v2, %v1754_v50  ;;  %v739_v7 = vpop.f32.mrb[15].mxu1  ;;  %v812_v8 = vpop.f32.mrb[23].mxu0  ;;  %v1805_v50 = vrot.slane %v1746_v42, %v331_v3 }
 0x224   :  { %v1400_v9 = vpack.c.bf16 %v736_v63, %v734_v57  ;;  %v1401_v10 = vpack.c.bf16 %v809_v0, %v807_v58  ;;  %v740_v11 = vadd.f32 %v739_v7, %v1757_v51  ;;  %v813_v12 = vadd.f32 %v812_v8, %v1760_v52 }
 0x226   :  { %1241 = vst [vmem:[#allocation8 + $0xc0] sm:$0xff] %v1400_v9  ;;  %1242 = vst [vmem:[#allocation8 + $0xc8] sm:$0xff] %v1401_v10  ;;  %v1404_v20 = vpack.c.bf16 %v740_v11, %v738_v5  ;;  %v1405_v18 = vpack.c.bf16 %v813_v12, %v811_v6 }
 0x228   :  { %1245 = vst [vmem:[#allocation8 + $0xe0] sm:$0xff] %v1404_v20  ;;  %1246 = vst [vmem:[#allocation8 + $0xe8] sm:$0xff] %v1405_v18  ;;  %v849_v51 = vpop.f32.mrb[16].mxu1  ;;  %v922_v52 = vpop.f32.mrb[24].mxu0 }
 0x229   :  { %v850_v16 = vadd.f32 %v849_v51, %v1799_v13  ;;  %v923_v17 = vadd.f32 %v922_v52, %v1802_v14  ;;  %v851_v21 = vpop.f32.mrb[17].mxu1  ;;  %v924_v22 = vpop.f32.mrb[25].mxu0 }
 0x22a   :  { %v852_v23 = vadd.f32 %v851_v21, %v1805_v50  ;;  %v925_v24 = vadd.f32 %v924_v22, %v1808_v15  ;;  %v853_v25 = vpop.f32.mrb[18].mxu1  ;;  %v926_v26 = vpop.f32.mrb[26].mxu0 }
 0x22b   :  { %v854_v27 = vadd.f32 %v853_v25, %v1799_v13  ;;  %v927_v42 = vadd.f32 %v926_v26, %v1802_v14  ;;  %v855_v28 = vpop.f32.mrb[19].mxu1  ;;  %v928_v29 = vpop.f32.mrb[27].mxu0 }
 0x22c   :  { %v1378_v30 = vpack.c.bf16 %v852_v23, %v850_v16  ;;  %v1379_v31 = vpack.c.bf16 %v925_v24, %v923_v17  ;;  %v856_v32 = vadd.f32 %v855_v28, %v1805_v50  ;;  %v929_v33 = vadd.f32 %v928_v29, %v1808_v15 }
 0x22e   :  { %1219 = vst [vmem:[#allocation8 + $0x10] sm:$0xff] %v1378_v30  ;;  %1220 = vst [vmem:[#allocation8 + $0x18] sm:$0xff] %v1379_v31  ;;  %v1382_v34 = vpack.c.bf16 %v856_v32, %v854_v27  ;;  %v1383_v35 = vpack.c.bf16 %v929_v33, %v927_v42 }
 0x230   :  { %1223 = vst [vmem:[#allocation8 + $0x30] sm:$0xff] %v1382_v34  ;;  %1224 = vst [vmem:[#allocation8 + $0x38] sm:$0xff] %v1383_v35  ;;  %v859_v36 = vpop.f32.mrb[20].mxu1  ;;  %v932_v37 = vpop.f32.mrb[28].mxu0 }
 0x231   :  { %v860_v40 = vadd.f32 %v859_v36, %v1799_v13  ;;  %v933_v41 = vadd.f32 %v932_v37, %v1802_v14  ;;  %v861_v43 = vpop.f32.mrb[21].mxu1  ;;  %v934_v44 = vpop.f32.mrb[29].mxu0 }
 0x232   :  { %v862_v45 = vadd.f32 %v861_v43, %v1805_v50  ;;  %v935_v46 = vadd.f32 %v934_v44, %v1808_v15  ;;  %v863_v47 = vpop.f32.mrb[22].mxu1  ;;  %v936_v19 = vpop.f32.mrb[30].mxu0 }
 0x233   :  { %v864_v38 = vadd.f32 %v863_v47, %v1799_v13  ;;  %v937_v39 = vadd.f32 %v936_v19, %v1802_v14  ;;  %v865_v48 = vpop.f32.mrb[23].mxu1  ;;  %v938_v49 = vpop.f32.mrb[31].mxu0 }
 0x234   :  { %v1386_v53 = vpack.c.bf16 %v862_v45, %v860_v40  ;;  %v1387_v54 = vpack.c.bf16 %v935_v46, %v933_v41  ;;  %v866_v55 = vadd.f32 %v865_v48, %v1805_v50  ;;  %v939_v56 = vadd.f32 %v938_v49, %v1808_v15 }
 0x236   :  { %1227 = vst [vmem:[#allocation8 + $0x50] sm:$0xff] %v1386_v53  ;;  %1228 = vst [vmem:[#allocation8 + $0x58] sm:$0xff] %v1387_v54  ;;  %v1390_v57 = vpack.c.bf16 %v866_v55, %v864_v38  ;;  %v1391_v58 = vpack.c.bf16 %v939_v56, %v937_v39 }
 0x238   :  { %1231 = vst [vmem:[#allocation8 + $0x70] sm:$0xff] %v1390_v57  ;;  %1232 = vst [vmem:[#allocation8 + $0x78] sm:$0xff] %v1391_v58  ;;  %v869_v59 = vpop.f32.mrb[24].mxu1 }
 0x239   :  { %v870_v60 = vadd.f32 %v869_v59, %v1799_v13  ;;  %v871_v61 = vpop.f32.mrb[25].mxu1 }
 0x23a   :  { %v872_v62 = vadd.f32 %v871_v61, %v1805_v50  ;;  %v873_v63 = vpop.f32.mrb[26].mxu1 }
 0x23b   :  { %v874_v0 = vadd.f32 %v873_v63, %v1799_v13  ;;  %v875_v1 = vpop.f32.mrb[27].mxu1 }
 0x23c   :  { %v1394_v2 = vpack.c.bf16 %v872_v62, %v870_v60  ;;  %v876_v3 = vadd.f32 %v875_v1, %v1805_v50 }
 0x23e   :  { %1235 = vst [vmem:[#allocation8 + $0x90] sm:$0xff] %v1394_v2  ;;  %v1398_v4 = vpack.c.bf16 %v876_v3, %v874_v0 }
 0x240   :  { %1239 = vst [vmem:[#allocation8 + $0xb0] sm:$0xff] %v1398_v4  ;;  %v879_v5 = vpop.f32.mrb[28].mxu1 }
 0x241   :  { %v880_v6 = vadd.f32 %v879_v5, %v1799_v13  ;;  %v881_v7 = vpop.f32.mrb[29].mxu1 }
 0x242   :  { %v882_v8 = vadd.f32 %v881_v7, %v1805_v50  ;;  %v883_v9 = vpop.f32.mrb[30].mxu1 }
 0x243   :  { %v884_v10 = vadd.f32 %v883_v9, %v1799_v13  ;;  %v885_v11 = vpop.f32.mrb[31].mxu1 }
 0x244   :  { %v1402_v12 = vpack.c.bf16 %v882_v8, %v880_v6  ;;  %v886_v20 = vadd.f32 %v885_v11, %v1805_v50 }
 0x246   :  { %1243 = vst [vmem:[#allocation8 + $0xd0] sm:$0xff] %v1402_v12  ;;  %v1406_v18 = vpack.c.bf16 %v886_v20, %v884_v10 }
 0x248   :  { %1247 = vst [vmem:[#allocation8 + $0xf0] sm:$0xff] %v1406_v18  ;;  %v942_v51 = vpop.f32.mrb[32].mxu1 }
 0x249   :  { %v943_v52 = vadd.f32 %v942_v51, %v1802_v14  ;;  %v944_v16 = vpop.f32.mrb[33].mxu1 }
 0x24a   :  { %v945_v17 = vadd.f32 %v944_v16, %v1808_v15  ;;  %v946_v21 = vpop.f32.mrb[34].mxu1 }
 0x24b   :  { %v947_v22 = vadd.f32 %v946_v21, %v1802_v14  ;;  %v948_v23 = vpop.f32.mrb[35].mxu1 }
 0x24c   :  { %v1395_v24 = vpack.c.bf16 %v945_v17, %v943_v52  ;;  %v949_v13 = vadd.f32 %v948_v23, %v1808_v15 }
 0x24e   :  { %1236 = vst [vmem:[#allocation8 + $0x98] sm:$0xff] %v1395_v24  ;;  %v1399_v25 = vpack.c.bf16 %v949_v13, %v947_v22 }
 0x250   :  { %1240 = vst [vmem:[#allocation8 + $0xb8] sm:$0xff] %v1399_v25  ;;  %v952_v50 = vpop.f32.mrb[36].mxu1 }
 0x251   :  { %v953_v26 = vadd.f32 %v952_v50, %v1802_v14  ;;  %v954_v27 = vpop.f32.mrb[37].mxu1 }
 0x252   :  { %v955_v42 = vadd.f32 %v954_v27, %v1808_v15  ;;  %v956_v28 = vpop.f32.mrb[38].mxu1 }
 0x253   :  { %v957_v29 = vadd.f32 %v956_v28, %v1802_v14  ;;  %v958_v30 = vpop.f32.mrb[39].mxu1 }
 0x254   :  { %v1403_v31 = vpack.c.bf16 %v955_v42, %v953_v26  ;;  %v959_v32 = vadd.f32 %v958_v30, %v1808_v15 }
 0x256   :  { %1244 = vst [vmem:[#allocation8 + $0xd8] sm:$0xff] %v1403_v31  ;;  %v1407_v33 = vpack.c.bf16 %v959_v32, %v957_v29 }
 0x258   :  { %1248 = vst [vmem:[#allocation8 + $0xf8] sm:$0xff] %v1407_v33 }
 0x259   :  { %1558 = shalt.err (!%p1555_p0)
}
 0x25a   :  { %s1559_s12 = scalar_lea.hbm %s1862_s5, 4096 }
 0x25b   :  { %p1560_p1 = scmp.ne.s32.totalorder %s1862_s5, %s1559_s12  ;;  %p1563_p2 = scmp.lt.u32.totalorder %s1559_s12, %s1862_s5 }
 0x25d   :  { %p1565_p3 = pnand %p1563_p2, %p1560_p1 }
 0x25f   :  { %1568 = shalt.err (!%p1565_p3)
}
 0x260   :  { %1260 = dma.vmem_to_hbm [thread:$0]  %s1255_s8, 4096, %s1862_s5, [#allocation4], %s1580_s0, %s1580_s0, %s1581_s21  }
 0x261   :  { %1573 = dma.done.wait [#allocation4], 4096  }
 0x262   :  { %1574 = vsyncadd [#allocation4], 4294963200 }
 0x263   :  { %1264 = vsyncpa [#allocation3], 1 }
 0x264   :  { %1265 = vsyncpa [#allocation6], 1 }
 0x265   :  { %1266 = vsyncpa [#allocation4], 1 }

</bundles_post_ra>
